<compile_context>
chip_gen: v7x
topology: tpu7x:2x2x1
jax: 0.10.0
libtpu: 0.0.40
codegen_flags: <defaults>
</compile_context>

<pallas_src>
import jax
import jax.numpy as jnp
from jax.experimental import pallas as pl
from jax.experimental.pallas import tpu as pltpu


def _vmem_budget_bytes():
    """Scoped-VMEM budget derived from the chip's physical VMEM."""
    cap = 64 * 1024 * 1024                 # conservative default: v7x per-core VMEM
    try:
        info = pltpu.get_tpu_info()
        cap = int(getattr(info, "vmem_capacity_bytes", cap))
    except Exception:
        pass
    # 64 MiB scoped on v5e/v6e (128 MiB physical), 32 MiB on v7x (64 MiB physical).
    return min(cap // 2, 64 * 1024 * 1024)


def _choose_tc(C, N, hw, itemsize, budget):
    """Channel-tile size: a divisor of C (multiple of 8, or C itself), as large
    as fits the per-step VMEM footprint, split only to keep >=2 grid steps."""
    # Live VMEM per grid step ~= 2x in + 2x out blocks (double-buffered, native
    # dtype) + ~6 full-tile f32 temporaries inside the kernel body.
    max_block_bytes = max((budget * itemsize) // (4 * itemsize + 6 * 4), 128 * 1024)
    divs = [d for d in range(8, C, 8) if C % d == 0]
    divs.append(C)
    fitting = [d for d in divs if d * hw * itemsize <= max_block_bytes]
    tc = max(fitting) if fitting else min(divs)
    # v7x runs 2 TensorCores per chip: keep >= 2 parallel grid steps when the
    # channels can be split for free (blocks stay HBM-contiguous either way).
    while N * (C // tc) < 2 and tc % 16 == 0 and C % (tc // 2) == 0:
        tc //= 2
    return tc


def _make_frelu_kernel(W, HW, x_dtype):
    f32 = jnp.float32
    sh_up = W % HW          # brings row h-1 down to row h in flattened space
    sh_dn = (HW - W) % HW   # brings row h+1 up to row h

    def kernel(x_ref, w_ref, b_ref, edge_ref, o_ref):
        # x_ref   : (1, TC, HW)  input tile, native dtype (flattened spatial on lanes)
        # w_ref   : (TC, 9) f32  depthwise weights, BN scale folded (col = kh*3+kw)
        # b_ref   : (TC, 1) f32  folded conv-bias + BN shift
        # edge_ref: (4, HW) f32  {0,1} keep-masks: [w>0, w<W-1, h>0, h<H-1]
        # o_ref   : (1, TC, HW)  output tile
        x_nat = x_ref[0]                       # (TC, HW) native dtype
        x = x_nat.astype(f32)
        wt = w_ref[...]                        # (TC, 9)
        sh = b_ref[...]                        # (TC, 1)
        nl = edge_ref[0:1]                     # zero the wrapped (w-1) tap at w==0
        nr = edge_ref[1:2]                     # zero the wrapped (w+1) tap at w==W-1
        nt = edge_ref[2:3]                     # zero the row-above tap at h==0
        nb = edge_ref[3:4]                     # zero the row-below tap at h==H-1

        # Horizontal neighbours via XLU lane rolls in flattened (h*W + w) space.
        x_l = pltpu.roll(x, shift=1, axis=1) * nl
        x_r = pltpu.roll(x, shift=HW - 1, axis=1) * nr

        # Separable row combinations for kernel rows kh = 0, 1, 2.
        r0 = x_l * wt[:, 0:1] + x * wt[:, 1:2] + x_r * wt[:, 2:3]
        r1 = x_l * wt[:, 3:4] + x * wt[:, 4:5] + x_r * wt[:, 5:6]
        r2 = x_l * wt[:, 6:7] + x * wt[:, 7:8] + x_r * wt[:, 8:9]

        # Vertical combination entirely as values; single store below.
        y = r1 + sh
        y = y + pltpu.roll(r0, shift=sh_up, axis=1) * nt
        y = y + pltpu.roll(r2, shift=sh_dn, axis=1) * nb

        # FReLU: max(x, BN(conv_dw(x))).
        o_ref[0] = jnp.maximum(x_nat, y.astype(x_dtype))

    return kernel


def frelu_pallas(x_nchw, conv_w, conv_b, bn_gamma, bn_beta, bn_mean, bn_var,
                 eps=1e-5):
    """FReLU forward. x_nchw: (N, C, H, W). conv_w: (C, 1, 3, 3) depthwise."""
    N, C, H, W = x_nchw.shape
    dtype = x_nchw.dtype
    isz = jnp.dtype(dtype).itemsize
    HW = H * W

    # NCHW kept as-is; flattening H,W is a free (contiguous) reshape — no
    # relayout HBM passes around the kernel.
    x3 = x_nchw.reshape(N, C, HW)

    # Fold BN (inference / running stats) into the depthwise conv parameters.
    # Weights stay in f32 (no quantization to the input dtype before the mul).
    inv_std = jax.lax.rsqrt(bn_var.astype(jnp.float32) + eps)
    scale = bn_gamma.astype(jnp.float32) * inv_std                      # (C,)
    w_eff = conv_w.reshape(C, 9).astype(jnp.float32) * scale[:, None]   # (C, 9)
    shift = ((conv_b.astype(jnp.float32) - bn_mean.astype(jnp.float32)) * scale
             + bn_beta.astype(jnp.float32)).reshape(C, 1)               # (C, 1)

    # Border keep-masks in flattened (h*W + w) lane space, built once on host
    # and kept resident across the whole grid.
    idx = jnp.arange(HW, dtype=jnp.int32)
    col = idx % W
    row = idx // W
    edge = jnp.stack([col != 0, col != W - 1, row != 0, row != H - 1]
                     ).astype(jnp.float32)                              # (4, HW)

    budget = _vmem_budget_bytes()
    TC = _choose_tc(C, N, HW, isz, budget)
    n_c = C // TC

    kernel = _make_frelu_kernel(W, HW, dtype)

    cost = pl.CostEstimate(
        flops=22 * N * C * HW,
        transcendentals=0,
        bytes_accessed=2 * N * C * HW * isz + (10 * C + 4 * HW) * 4,
    )

    out3 = pl.pallas_call(
        kernel,
        out_shape=jax.ShapeDtypeStruct((N, C, HW), dtype),
        grid_spec=pltpu.PrefetchScalarGridSpec(
            num_scalar_prefetch=0,
            # Channel-tile axis outermost: the weight / shift / mask blocks keep
            # the same block index across the inner sweep and are not re-DMA'd.
            grid=(n_c, N),
            in_specs=[
                pl.BlockSpec((1, TC, HW), lambda c, n: (n, c, 0)),
                pl.BlockSpec((TC, 9), lambda c, n: (c, 0)),
                pl.BlockSpec((TC, 1), lambda c, n: (c, 0)),
                pl.BlockSpec((4, HW), lambda c, n: (0, 0)),
            ],
            out_specs=pl.BlockSpec((1, TC, HW), lambda c, n: (n, c, 0)),
        ),
        compiler_params=pltpu.CompilerParams(
            dimension_semantics=("parallel", "parallel"),
            vmem_limit_bytes=budget,
        ),
        cost_estimate=cost,
    )(x3, w_eff, shift, edge)

    return out3.reshape(N, C, H, W)


def frelu_reference(x_nchw, conv_w, conv_b, bn_gamma, bn_beta, bn_mean, bn_var,
                    eps=1e-5):
    """Pure-JAX reference (NCHW) for correctness checking."""
    N, C, H, W = x_nchw.shape
    y = jax.lax.conv_general_dilated(
        x_nchw, conv_w, window_strides=(1, 1), padding=((1, 1), (1, 1)),
        dimension_numbers=("NCHW", "OIHW", "NCHW"),
        feature_group_count=C)
    y = y + conv_b.reshape(1, C, 1, 1)
    inv_std = 1.0 / jnp.sqrt(bn_var + eps)
    y = (y - bn_mean.reshape(1, C, 1, 1)) * (bn_gamma * inv_std).reshape(
        1, C, 1, 1) + bn_beta.reshape(1, C, 1, 1)
    return jnp.maximum(x_nchw, y)


if __name__ == "__main__":
    def make_params(key, N, C, H, W, dtype):
        k_x, k_w, k_b, k_g, k_be, k_m, k_v = jax.random.split(key, 7)
        x = jax.random.normal(k_x, (N, C, H, W), dtype=jnp.float32).astype(dtype)
        conv_w = jax.random.normal(k_w, (C, 1, 3, 3), dtype=jnp.float32) * 0.2
        conv_b = jax.random.normal(k_b, (C,), dtype=jnp.float32) * 0.1
        bn_gamma = 1.0 + 0.1 * jax.random.normal(k_g, (C,), dtype=jnp.float32)
        bn_beta = 0.1 * jax.random.normal(k_be, (C,), dtype=jnp.float32)
        bn_mean = 0.05 * jax.random.normal(k_m, (C,), dtype=jnp.float32)
        bn_var = jnp.abs(jax.random.normal(k_v, (C,), dtype=jnp.float32)) + 0.5
        return x, (conv_w, conv_b, bn_gamma, bn_beta, bn_mean, bn_var)

    def run_case(key, N, C, H, W, dtype=jnp.float32, atol=1e-5, rtol=1e-5):
        x, params = make_params(key, N, C, H, W, dtype)
        out = frelu_pallas(x, *params)
        out = jax.block_until_ready(out)
        ref = frelu_reference(x.astype(jnp.float32), *params).astype(dtype)
        assert out.shape == (N, C, H, W)
        assert out.dtype == dtype
        assert jnp.allclose(out.astype(jnp.float32), ref.astype(jnp.float32),
                            atol=atol, rtol=rtol), (
            f"mismatch vs reference for shape {(N, C, H, W)} dtype {dtype}")

    root = jax.random.PRNGKey(0)
    k1, k2, k3 = jax.random.split(root, 3)
    # Small case from the spec: C=4 stays off the lane axis entirely now
    # (flattened 16x16 spatial -> 256 lanes), single channel tile, grid (1, 2).
    run_case(k1, N=2, C=4, H=16, W=16)
    # Channel-tiled case: C=256 splits into two 128-channel tiles (both v7x
    # TensorCores get work); H != W exercises the row/col masks (24*16 = 384 lanes).
    run_case(k2, N=1, C=256, H=24, W=16)
    # bf16 path: weights/shift stay f32, accumulation in f32, cast at the end.
    run_case(k3, N=2, C=4, H=16, W=16, dtype=jnp.bfloat16, atol=5e-2, rtol=5e-2)

    print("KERNEL_OK")
</pallas_src>

<mosaic_0001>
module attributes {stable_mosaic.version = 11 : i64} {
  func.func @kernel(%arg0: i32, %arg1: i32, %arg2: memref<1x4x256xf32, #tpu.memory_space<vmem>>, %arg3: memref<4x9xf32, #tpu.memory_space<vmem>>, %arg4: memref<4x1xf32, #tpu.memory_space<vmem>>, %arg5: memref<4x256xf32, #tpu.memory_space<vmem>>, %arg6: memref<1x4x256xf32, #tpu.memory_space<vmem>>) attributes {dimension_semantics = [#tpu.dimension_semantics<parallel>, #tpu.dimension_semantics<parallel>], iteration_bounds = array<i64: 1, 2>, scalar_prefetch = 0 : i64, scratch_operands = 0 : i64, tpu.core_type = #tpu.core_type<tc>, window_params = [{transform_indices = @transform_0, window_bounds = array<i64: 1, 4, 256>}, {transform_indices = @transform_1, window_bounds = array<i64: 4, 9>}, {transform_indices = @transform_2, window_bounds = array<i64: 4, 1>}, {pipeline_mode = #tpu.pipeline_mode<synchronous>, transform_indices = @transform_3, window_bounds = array<i64: 4, 256>}, {transform_indices = @transform_4, window_bounds = array<i64: 1, 4, 256>}]} {
    %c0 = arith.constant 0 : index
    %c0_0 = arith.constant 0 : index
    %c0_1 = arith.constant 0 : index
    %0 = vector.load %arg2[%c0, %c0_0, %c0_1] : memref<1x4x256xf32, #tpu.memory_space<vmem>>, vector<1x4x256xf32>
    %1 = vector.shape_cast %0 : vector<1x4x256xf32> to vector<4x256xf32>
    %c0_2 = arith.constant 0 : index
    %c0_3 = arith.constant 0 : index
    %2 = vector.load %arg3[%c0_2, %c0_3] : memref<4x9xf32, #tpu.memory_space<vmem>>, vector<4x9xf32>
    %c0_4 = arith.constant 0 : index
    %c0_5 = arith.constant 0 : index
    %3 = vector.load %arg4[%c0_4, %c0_5] : memref<4x1xf32, #tpu.memory_space<vmem>>, vector<4x1xf32>
    %c0_6 = arith.constant 0 : index
    %c0_7 = arith.constant 0 : index
    %4 = vector.load %arg5[%c0_6, %c0_7] : memref<4x256xf32, #tpu.memory_space<vmem>>, vector<1x256xf32>
    %c1 = arith.constant 1 : index
    %c0_8 = arith.constant 0 : index
    %5 = vector.load %arg5[%c1, %c0_8] : memref<4x256xf32, #tpu.memory_space<vmem>>, vector<1x256xf32>
    %c2 = arith.constant 2 : index
    %c0_9 = arith.constant 0 : index
    %6 = vector.load %arg5[%c2, %c0_9] : memref<4x256xf32, #tpu.memory_space<vmem>>, vector<1x256xf32>
    %c3 = arith.constant 3 : index
    %c0_10 = arith.constant 0 : index
    %7 = vector.load %arg5[%c3, %c0_10] : memref<4x256xf32, #tpu.memory_space<vmem>>, vector<1x256xf32>
    %c1_i32 = arith.constant 1 : i32
    %8 = tpu.dynamic_rotate %1 by %c1_i32 dim 1 : vector<4x256xf32>, i32 -> vector<4x256xf32>
    %9 = vector.broadcast %4 : vector<1x256xf32> to vector<4x256xf32>
    %10 = arith.mulf %8, %9 : vector<4x256xf32>
    %c255_i32 = arith.constant 255 : i32
    %11 = tpu.dynamic_rotate %1 by %c255_i32 dim 1 : vector<4x256xf32>, i32 -> vector<4x256xf32>
    %12 = vector.broadcast %5 : vector<1x256xf32> to vector<4x256xf32>
    %13 = arith.mulf %11, %12 : vector<4x256xf32>
    %14 = vector.extract_strided_slice %2 {offsets = [0, 0], sizes = [4, 1], strides = [1, 1]} : vector<4x9xf32> to vector<4x1xf32>
    %15 = vector.broadcast %14 : vector<4x1xf32> to vector<4x256xf32>
    %16 = arith.mulf %10, %15 : vector<4x256xf32>
    %17 = vector.extract_strided_slice %2 {offsets = [0, 1], sizes = [4, 1], strides = [1, 1]} : vector<4x9xf32> to vector<4x1xf32>
    %18 = vector.broadcast %17 : vector<4x1xf32> to vector<4x256xf32>
    %19 = arith.mulf %1, %18 : vector<4x256xf32>
    %20 = arith.addf %16, %19 : vector<4x256xf32>
    %21 = vector.extract_strided_slice %2 {offsets = [0, 2], sizes = [4, 1], strides = [1, 1]} : vector<4x9xf32> to vector<4x1xf32>
    %22 = vector.broadcast %21 : vector<4x1xf32> to vector<4x256xf32>
    %23 = arith.mulf %13, %22 : vector<4x256xf32>
    %24 = arith.addf %20, %23 : vector<4x256xf32>
    %25 = vector.extract_strided_slice %2 {offsets = [0, 3], sizes = [4, 1], strides = [1, 1]} : vector<4x9xf32> to vector<4x1xf32>
    %26 = vector.broadcast %25 : vector<4x1xf32> to vector<4x256xf32>
    %27 = arith.mulf %10, %26 : vector<4x256xf32>
    %28 = vector.extract_strided_slice %2 {offsets = [0, 4], sizes = [4, 1], strides = [1, 1]} : vector<4x9xf32> to vector<4x1xf32>
    %29 = vector.broadcast %28 : vector<4x1xf32> to vector<4x256xf32>
    %30 = arith.mulf %1, %29 : vector<4x256xf32>
    %31 = arith.addf %27, %30 : vector<4x256xf32>
    %32 = vector.extract_strided_slice %2 {offsets = [0, 5], sizes = [4, 1], strides = [1, 1]} : vector<4x9xf32> to vector<4x1xf32>
    %33 = vector.broadcast %32 : vector<4x1xf32> to vector<4x256xf32>
    %34 = arith.mulf %13, %33 : vector<4x256xf32>
    %35 = arith.addf %31, %34 : vector<4x256xf32>
    %36 = vector.extract_strided_slice %2 {offsets = [0, 6], sizes = [4, 1], strides = [1, 1]} : vector<4x9xf32> to vector<4x1xf32>
    %37 = vector.broadcast %36 : vector<4x1xf32> to vector<4x256xf32>
    %38 = arith.mulf %10, %37 : vector<4x256xf32>
    %39 = vector.extract_strided_slice %2 {offsets = [0, 7], sizes = [4, 1], strides = [1, 1]} : vector<4x9xf32> to vector<4x1xf32>
    %40 = vector.broadcast %39 : vector<4x1xf32> to vector<4x256xf32>
    %41 = arith.mulf %1, %40 : vector<4x256xf32>
    %42 = arith.addf %38, %41 : vector<4x256xf32>
    %43 = vector.extract_strided_slice %2 {offsets = [0, 8], sizes = [4, 1], strides = [1, 1]} : vector<4x9xf32> to vector<4x1xf32>
    %44 = vector.broadcast %43 : vector<4x1xf32> to vector<4x256xf32>
    %45 = arith.mulf %13, %44 : vector<4x256xf32>
    %46 = arith.addf %42, %45 : vector<4x256xf32>
    %47 = vector.broadcast %3 : vector<4x1xf32> to vector<4x256xf32>
    %48 = arith.addf %35, %47 : vector<4x256xf32>
    %c16_i32 = arith.constant 16 : i32
    %49 = tpu.dynamic_rotate %24 by %c16_i32 dim 1 : vector<4x256xf32>, i32 -> vector<4x256xf32>
    %50 = vector.broadcast %6 : vector<1x256xf32> to vector<4x256xf32>
    %51 = arith.mulf %49, %50 : vector<4x256xf32>
    %52 = arith.addf %48, %51 : vector<4x256xf32>
    %c240_i32 = arith.constant 240 : i32
    %53 = tpu.dynamic_rotate %46 by %c240_i32 dim 1 : vector<4x256xf32>, i32 -> vector<4x256xf32>
    %54 = vector.broadcast %7 : vector<1x256xf32> to vector<4x256xf32>
    %55 = arith.mulf %53, %54 : vector<4x256xf32>
    %56 = arith.addf %52, %55 : vector<4x256xf32>
    %57 = arith.maximumf %1, %56 : vector<4x256xf32>
    %c0_11 = arith.constant 0 : index
    %c0_12 = arith.constant 0 : index
    %c0_13 = arith.constant 0 : index
    %58 = vector.load %arg6[%c0_11, %c0_12, %c0_13] : memref<1x4x256xf32, #tpu.memory_space<vmem>>, vector<1x4x256xf32>
    %59 = vector.shape_cast %58 : vector<1x4x256xf32> to vector<4x256xf32>
    %60 = vector.shape_cast %57 : vector<4x256xf32> to vector<1x4x256xf32>
    tpu.vector_store %arg6[%c0_11, %c0_12, %c0_13], %60 {strides = array<i32>} : memref<1x4x256xf32, #tpu.memory_space<vmem>>, vector<1x4x256xf32>,
    return
  }
  func.func @transform_0(%arg0: i32, %arg1: i32) -> (i32, i32, i32) {
    %c0_i32 = arith.constant 0 : i32
    %c0_i32_0 = arith.constant 0 : i32
    return %arg1, %arg0, %c0_i32 : i32, i32, i32
  }
  func.func @transform_1(%arg0: i32, %arg1: i32) -> (i32, i32) {
    %c0_i32 = arith.constant 0 : i32
    %c0_i32_0 = arith.constant 0 : i32
    return %arg0, %c0_i32 : i32, i32
  }
  func.func @transform_2(%arg0: i32, %arg1: i32) -> (i32, i32) {
    %c0_i32 = arith.constant 0 : i32
    %c0_i32_0 = arith.constant 0 : i32
    return %arg0, %c0_i32 : i32, i32
  }
  func.func @transform_3(%arg0: i32, %arg1: i32) -> (i32, i32) {
    %c0_i32 = arith.constant 0 : i32
    %c0_i32_0 = arith.constant 0 : i32
    %c0_i32_1 = arith.constant 0 : i32
    return %c0_i32, %c0_i32_0 : i32, i32
  }
  func.func @transform_4(%arg0: i32, %arg1: i32) -> (i32, i32, i32) {
    %c0_i32 = arith.constant 0 : i32
    %c0_i32_0 = arith.constant 0 : i32
    return %arg1, %arg0, %c0_i32 : i32, i32, i32
  }
}

</mosaic_0001>

<bundles_post_ra>
// kernel: tpu_custom_call.1
= control target key start
LH: loop header
LB: loop body
LE: loop exit
PB: predicated region body
PF: predicated region fallthrough
CT: control target
= control target key end

     0   :  { %9 = vsyncpa [#allocation3], 0  ;;  %s1089_s0 = inlined_call_operand.hbm [shape: f32[2,4,256], index: 0, kind: input, shape index: {}]   ;;  %s1090_s1 = inlined_call_operand.vmem [shape: f32[4,9], index: 1, kind: input, shape index: {}]   ;;  %s1091_s2 = inlined_call_operand.vmem [shape: f32[4,1], index: 2, kind: input, shape index: {}]   ;;  %s1092_s3 = inlined_call_operand.vmem [shape: f32[4,256], index: 3, kind: input, shape index: {}]   ;;  %s1093_s4 = inlined_call_operand.hbm [shape: f32[2,4,256], index: 4, kind: output, shape index: {}]  }
   0x1   :  { %11 = vsyncpa [#allocation3 + $0x1], 0 }
   0x2   :  { %12 = vsyncpa [#allocation4], 0 }
   0x3   :  { %14 = vsyncpa [#allocation4 + $0x1], 0  ;;  %s867_s15 = smov 0   ;;  %s869_s16 = smov 0  }
   0x4   :  { %s871_s17 = smov 0   ;;  %s873_s18 = smov 0  }
   0x5   :  { %s875_s19 = smov 0   ;;  %s877_s20 = smov 0  }
   0x6 LB: > { %s603_s21 = sadd.s32 4294967295, %s824_s20   ;;  %s604_s22 = sadd.s32 4294967294, %s824_s20   ;;  %s824_s20 = sphi %s877_s20, %s20_s20   ;;  %s820_s19 = sphi %s875_s19, %s1109_s19   ;;  %s816_s18 = sphi %s873_s18, %s1108_s18   ;;  %s812_s17 = sphi %s871_s17, %s1107_s17   ;;  %s808_s16 = sphi %s869_s16, %s1106_s16   ;;  %s804_s15 = sphi %s867_s15, %s1105_s15  }
   0x7   : > { %s29_s23 = sadd.s32 1, %s820_s19  ;;  %s41_s24 = sadd.s32 1, %s812_s17 }
   0x8   : > { %p30_p0 = scmp.ge.s32.totalorder %s29_s23, 2  ;;  %p48_p1 = scmp.ne.s32.totalorder %s812_s17, %s808_s16 }
   0x9   : > { %p49_p2 = scmp.eq.s32.totalorder %s824_s20, 0  ;;  %p54_p3 = scmp.ne.s32.totalorder %s808_s16, %s804_s15 }
   0xa   : > { %s1111_s23 = smov (%p30_p0, %s29_s23), 0  ;;  %p55_p5 = scmp.eq.s32.totalorder %s603_s21, 0 }
   0xb   : > { %p908_p4 = por %p49_p2, %p48_p1  ;;  %s36_s26 = ssub.s32 %s820_s19, %s1111_s23 }
   0xc   : > { %p153_p6 = scmp.eq.s32.totalorder %s603_s21, 1  ;;  %p39_p7 = scmp.eq.s32.totalorder %s36_s26, 0 }
   0xd   : > { %p914_p8 = por %p55_p5, %p54_p3  ;;  %p159_p10 = scmp.eq.s32.totalorder %s604_s22, 1 }
   0xe   : > { %p918_p9 = por %p153_p6, %p48_p1  ;;  %p637_p13 = scmp.lt.s32.totalorder %s824_s20, 2 }
   0xf   : > { %s923_s29 = scalar_select %p39_p7, %s812_s17, %s41_s24  }
  0x10   : > { %s1097_s28 = scalar_select %p918_p9, 1, 0 }
  0x11   : > { %p925_p11 = por %p159_p10, %p54_p3  ;;  %s196_s5 = sand.u32 1, %s812_s17  }
  0x12   : > { %s609_s6 = sshll.u32 %s196_s5, 3  ;;  %s623_s7 = sshll.u32 %s820_s19, 7 }
  0x13   : > { %s1098_s30 = scalar_select %p925_p11, 1, 0 }
  0x14   : > { %s936_s10 = scalar_lea.hbm %s1089_s0, %s623_s7  ;;  %s200_s11 = scalar_lea.vmem [#allocation2], %s609_s6 }
  0x15   : > { %s210_s12 = sshll.u32 %s200_s11, 4  ;;  %p942_p0 = pnand %p637_p13, %p908_p4  ;;  %s938_s12 = int_to_ptr.vmem [resolvable:$true] %s210_s12 }
  0x16   : > { %s197_s14 = scalar_lea.sflag [#allocation3], %s196_s5  ;;  %s712_s21 = scalar_lea.hbm %s936_s10, 128 }
  0x17   : > { %p713_p3 = scmp.ne.s32.totalorder %s936_s10, %s712_s21  ;;  %p714_p5 = pneg %p942_p0 }
  0x18   : > { %s717_s25 = scalar_lea.hbm %s1089_s0, 256  ;;  %p718_p4 = scmp.lt.u32.totalorder %s936_s10, %s1089_s0 }
  0x19   : > { %p715_p6 = pnand %p714_p5, %p713_p3  ;;  %p719_p10 = scmp.lt.u32.totalorder %s717_s25, %s712_s21 }
  0x1a   : > { %p721_p12 = scmp.lt.u32.totalorder %s712_s21, %s936_s10 }
  0x1b   : > { %p716_p7 = pneg %p715_p6  ;;  %p720_p13 = por %p719_p10, %p718_p4 }
  0x1d   : > { %p722_p1 = por %p721_p12, %p720_p13 }
  0x1f   : > { %p723_p2 = pnand %p722_p1, %p716_p7 }
  0x21   : > { %726 = shalt.err (!%p723_p2)
}
  0x22   : > { %s727_s5 = scalar_lea.vmem %s938_s12, 128  ;;  %s826_s7 = smov [#allocation2]  }
  0x23   : > { %p728_p3 = scmp.ne.s32.totalorder %s938_s12, %s727_s5  ;;  %s732_s8 = sshll.u32 %s826_s7, 4  ;;  %s733_s8 = int_to_ptr.vmem [resolvable:$false] %s732_s8 }
  0x24   : > { %s734_s9 = scalar_lea.vmem %s733_s8, 256  ;;  %p735_p9 = scmp.lt.s32.totalorder %s938_s12, %s733_s8 }
  0x25   : > { %p730_p6 = pnand %p728_p3, %p714_p5  ;;  %p736_p4 = scmp.lt.s32.totalorder %s734_s9, %s727_s5 }
  0x27   : > { %p731_p11 = pneg %p730_p6  ;;  %p737_p10 = por %p736_p4, %p735_p9 }
  0x29   : > { %p738_p12 = pnand %p737_p10, %p731_p11 }
  0x2b   : > { %741 = shalt.err (!%p738_p12)
}
  0x2c   : > { %632 = dma.hbm_to_vmem [thread:$0]  (!%p942_p0), %s936_s10, 128, %s938_s12, %s197_s14  }
  0x2d   : > { %p1100_p1 = scmp.lt.s32.totalorder %s824_s20, 3  ;;  %p1101_p2 = scmp.ge.s32.totalorder %s824_s20, 1 }
  0x2f   : > { %p216_p5 = pnand %p1101_p2, %p1100_p1 }
  0x30   : > { %s978_s11 = sand.u32 (!%p216_p5), 1, %s808_s16  }
  0x31   : > { %219 = sbr.rel (%p216_p5) target bundleno = 362 (0x16a), region = 36  ;;  %s613_s21 = sshll.u32 (!%p216_p5), %s978_s11, 3 }
  0x32   : > { %s222_s22 = scalar_lea.sflag (!%p216_p5), [#allocation3], %s978_s11  ;;  %s225_s13 = scalar_lea.vmem (!%p216_p5), [#allocation2], %s613_s21 }
  0x38   : > { %795 = dma.done.wait (%p914_p8), %s222_s22, 128  }
  0x39   : > { %797 = vsyncadd (%p914_p8), %s222_s22, 4294967168  ;;  %v827_v0 = vmov 0   ;;  %v828_v1 = vmov 1   ;;  %v267_v2 = vld [vmem:[%s1090_s1] sm:$0xf]  ;;  %v829_v3 = vmov 2   ;;  %v283_v15 = vlaneseq }
  0x3a   : > { %703 = vset.pattern.permute.xlu1 %v827_v0  ;;  %701 = vset.pattern.permute.xlu0 %v828_v1  ;;  %v830_v4 = vmov 7   ;;  %v991_v5 = vld [vmem:[%s225_s13] sm:$0xff]  ;;  %v831_v6 = vmov 6   ;;  %s832_s27 = smov 1   ;;  %v833_v8 = vmov 8   ;;  %v834_v9 = vmov 3  }
  0x3b   : > { %323 = vperm.xlu1 %703, %v267_v2   ;;  %329 = vperm.xlu0 %701, %v267_v2   ;;  %v277_v7 = vcombine.high %v991_v5, %v991_v5  ;;  %v835_v10 = vmov 4   ;;  %s836_s14 = smov 127   ;;  %v268_v11 = vld [vmem:[%s1091_s2] sm:$0xf]  ;;  %v837_v12 = vmov 5   ;;  %v290_v18 = vshrl.u32 %v283_v15, 7 }
  0x3c   : > { %v838_v19 = vmov 839922192   ;;  %v1000_v21 = vand.u32 127, %v283_v15  ;;  %v269_v25 = vld [vmem:[%s1092_s3] ss:$4 sm:$0x3] }
  0x3d   : > { %v332_v20 = vunpack.c.l.s4 %v838_v19  ;;  %v1002_v24 = vsub.s32 0, %v290_v18  ;;  %v1008_v27 = vsub.s32 1, %v290_v18  ;;  %v615_v34 = vld [vmem:[%s1092_s3 + $0x1] ss:$4 sm:$0x3]  ;;  %s839_s8 = smov 112  }
  0x3e   : > { %vm285_vm0 = vcmp.lt.s32.totalorder %v1000_v21, 1  ;;  %vm305_vm1 = vcmp.lt.s32.totalorder %v1000_v21, 127  ;;  %s840_s9 = smov 16   ;;  %vm426_vm2 = vcmp.lt.s32.totalorder %v1000_v21, 16  ;;  %vm448_vm3 = vcmp.lt.s32.totalorder %v1000_v21, 112  ;;  %s473_s5 = scalar_lea.sflag [#allocation4], %s978_s11 }
  0x3f   : > { %704 = vset.pattern.permute.xlu1 %v829_v3  ;;  %702 = vset.pattern.permute.xlu0 %v830_v4  ;;  %v333_v26 = vunpack.c.0.s8 %v332_v20  ;;  %v292_v29 = vrot.slane %v269_v25, %v1002_v24  ;;  %v296_v33 = vrot.slane %v269_v25, %v1008_v27  ;;  %v312_v42 = vrot.slane %v615_v34, %v1002_v24  ;;  %v617_v25 = vld [vmem:[%s1092_s3 + $0x3] ss:$4 sm:$0x3]  ;;  %p1102_p9 = scmp.ne.s32.totalorder %s1097_s28, 0 }
  0x40   : > { %346 = vperm.xlu1 %704, %v267_v2   ;;  %391 = vperm.xlu0 %702, %v267_v2   ;;  %v316_v43 = vrot.slane %v615_v34, %v1008_v27  ;;  %v459_v34 = vrot.slane %v617_v25, %v1008_v27 }
  0x41   : > { %v336_v32 = vsub.s32 %v333_v26, %v290_v18 }
  0x44   : > { %705 = vset.pattern.permute.xlu1 %v831_v6  ;;  %279 = vrot.lane.b32.xlu0 %v991_v5, %s832_s27 }
  0x45   : > { %385 = vperm.xlu1 %705, %v267_v2   ;;  %706 = vset.pattern.permute.xlu0 %v833_v8 }
  0x48   : > { %408 = vperm.xlu0 %706, %v267_v2  }
  0x49   : > { %281 = vrot.lane.b32.xlu1 %v277_v7, %s832_s27  ;;  %s624_s27 = sshll.u32 %s816_s18, 7  ;;  %s841_s18 = smov [#allocation5]  }
  0x4a   : > { %708 = vset.pattern.permute.xlu1 %v834_v9  ;;  %s1040_s6 = scalar_lea.hbm %s1093_s4, %s624_s27 }
  0x4c   : > { %707 = vset.pattern.permute.xlu0 %v835_v10 }
  0x4d   : > { %301 = vrot.lane.b32.xlu1 %v991_v5, %s836_s14  ;;  %360 = vperm.xlu0 %707, %v267_v2  }
  0x51   : > { %303 = vrot.lane.b32.xlu1 %v277_v7, %s836_s14  ;;  %710 = vset.pattern.permute.xlu0 %v827_v0  ;;  %s257_s14 = scalar_lea.vmem [#allocation5], %s613_s21  ;;  %s746_s21 = sshll.u32 %s841_s18, 4  ;;  %s747_s21 = int_to_ptr.vmem [resolvable:$false] %s746_s21 }
  0x52   : > { %417 = vperm.xlu0 %710, %v268_v11   ;;  %s489_s24 = sshll.u32 %s257_s14, 4  ;;  %s1042_s24 = int_to_ptr.vmem [resolvable:$true] %s489_s24 }
  0x53   : > { %s742_s7 = scalar_lea.vmem %s1042_s24, 128  ;;  %p749_p7 = scmp.lt.s32.totalorder %s1042_s24, %s747_s21 }
  0x54   : > { %p743_p8 = scmp.ne.s32.totalorder %s1042_s24, %s742_s7 }
  0x55   : > { %354 = vperm.xlu1 %708, %v267_v2  }
  0x56   : > { %p744_p11 = pnand %p743_p8, %p1102_p9 }
  0x58   : > { %p745_p0 = pneg %p744_p11 }
  0x59   : > { %709 = vset.pattern.permute.xlu1 %v837_v12 }
  0x5a   : > { %377 = vperm.xlu1 %709, %v267_v2  }
  0xba   : > { %v324_v13 = vpop.permute.xlu1 %323  ;;  %v330_v14 = vpop.permute.xlu0 %329 }
  0xbb   : > { %v337_v40 = vrot.slane %v330_v14, %v336_v32 }
  0xbd   : > { %v339_v51 = vmul.f32 %v337_v40, %v991_v5 }
  0xbf   : > { %v347_v16 = vpop.permute.xlu1 %346  ;;  %v392_v17 = vpop.permute.xlu0 %391  ;;  %v341_v0 = vcombine.high %v339_v51, %v339_v51 }
  0xc0   : > { %v399_v41 = vrot.slane %v392_v17, %v336_v32 }
  0xc2   : > { %v401_v52 = vmul.f32 %v399_v41, %v991_v5 }
  0xc3   : > { %v280_v22 = vpop.permute.xlu0 %279 }
  0xc4   : > { %v386_v23 = vpop.permute.xlu1 %385  ;;  %v403_v7 = vcombine.high %v401_v52, %v401_v52 }
  0xc7   : > { %v409_v28 = vpop.permute.xlu0 %408 }
  0xc8   : > { %v282_v30 = vpop.permute.xlu1 %281 }
  0xc9   : > { %v287_v31 = vsel %vm285_vm0, %v282_v30, %v280_v22  ;;  %v286_v35 = vsel %vm285_vm0, %v280_v22, %v282_v30 }
  0xca   : > { %v299_v36 = vmul.f32 %v292_v29, %v287_v31  ;;  %v300_v44 = vmul.f32 %v296_v33, %v286_v35  ;;  %v455_v33 = vrot.slane %v617_v25, %v1002_v24 }
  0xcc   : > { %v302_v37 = vpop.permute.xlu1 %301  ;;  %v361_v38 = vpop.permute.xlu0 %360  ;;  %v326_v46 = vmul.f32 %v324_v13, %v299_v36  ;;  %v388_v47 = vmul.f32 %v386_v23, %v299_v36  ;;  %v327_v55 = vmul.f32 %v324_v13, %v300_v44  ;;  %v389_v8 = vmul.f32 %v386_v23, %v300_v44 }
  0xcd   : > { %v368_v39 = vrot.slane %v361_v38, %v336_v32 }
  0xce   : > { %v405_v58 = vadd.f32 %v401_v52, %v388_v47  ;;  %v343_v60 = vadd.f32 %v339_v51, %v326_v46  ;;  %v344_v9 = vadd.f32 %v341_v0, %v327_v55  ;;  %v406_v18 = vadd.f32 %v403_v7, %v389_v8 }
  0xcf   : > { %v370_v45 = vmul.f32 %v368_v39, %v991_v5 }
  0xd0   : > { %v304_v48 = vpop.permute.xlu1 %303 }
  0xd1   : > { %v306_v49 = vsel %vm305_vm1, %v302_v37, %v304_v48  ;;  %v307_v50 = vsel %vm305_vm1, %v304_v48, %v302_v37  ;;  %v372_v56 = vcombine.high %v370_v45, %v370_v45  ;;  %v418_v26 = vpop.permute.xlu0 %417 }
  0xd2   : > { %v319_v53 = vmul.f32 %v312_v42, %v306_v49  ;;  %v320_v54 = vmul.f32 %v316_v43, %v307_v50 }
  0xd4   : > { %v355_v57 = vpop.permute.xlu1 %354  ;;  %v411_v59 = vmul.f32 %v409_v28, %v319_v53  ;;  %v349_v61 = vmul.f32 %v347_v16, %v319_v53  ;;  %v350_v3 = vmul.f32 %v347_v16, %v320_v54  ;;  %v412_v14 = vmul.f32 %v409_v28, %v320_v54  ;;  %v616_v16 = vld [vmem:[%s1092_s3 + $0x2] ss:$4 sm:$0x3] }
  0xd5   : > { %v357_v62 = vmul.f32 %v355_v57, %v299_v36  ;;  %v358_v63 = vmul.f32 %v355_v57, %v300_v44  ;;  %v433_v22 = vrot.slane %v616_v16, %v1002_v24  ;;  %v437_v23 = vrot.slane %v616_v16, %v1008_v27 }
  0xd6   : > { %v413_v1 = vadd.f32 %v411_v59, %v405_v58  ;;  %v351_v2 = vadd.f32 %v349_v61, %v343_v60  ;;  %v352_v13 = vadd.f32 %v350_v3, %v344_v9  ;;  %v414_v19 = vadd.f32 %v412_v14, %v406_v18 }
  0xd7   : > { %v374_v4 = vadd.f32 %v370_v45, %v357_v62  ;;  %v375_v6 = vadd.f32 %v372_v56, %v358_v63 }
  0xd8   : > { %444 = vrot.lane.b32.xlu0 %v413_v1, %s839_s8  ;;  %422 = vrot.lane.b32.xlu1 %v351_v2, %s840_s9 }
  0xd9   : > { %v378_v10 = vpop.permute.xlu1 %377 }
  0xda   : > { %v380_v11 = vmul.f32 %v378_v10, %v319_v53  ;;  %v381_v12 = vmul.f32 %v378_v10, %v320_v54 }
  0xdc   : > { %424 = vrot.lane.b32.xlu1 %v352_v13, %s840_s9  ;;  %v382_v15 = vadd.f32 %v380_v11, %v374_v4  ;;  %v383_v17 = vadd.f32 %v381_v12, %v375_v6 }
  0xde   : > { %v420_v35 = vadd.f32 %v418_v26, %v382_v15  ;;  %v421_v36 = vadd.f32 %v418_v26, %v383_v17 }
  0xe0   : > { %446 = vrot.lane.b32.xlu1 %v414_v19, %s839_s8  ;;  %s748_s8 = scalar_lea.vmem %s747_s21, 256 }
  0xe1   : > { %p750_p13 = scmp.lt.s32.totalorder %s748_s8, %s742_s7 }
  0xe3   : > { %p751_p3 = por %p750_p13, %p749_p7 }
  0xe5   : > { %p752_p6 = pnand %p751_p3, %p745_p0 }
 0x14a   : > { %v423_v20 = vpop.permute.xlu1 %422  ;;  %v445_v37 = vpop.permute.xlu0 %444 }
 0x14e   : > { %v425_v28 = vpop.permute.xlu1 %424 }
 0x14f   : > { %v427_v29 = vsel %vm426_vm2, %v423_v20, %v425_v28  ;;  %v428_v30 = vsel %vm426_vm2, %v425_v28, %v423_v20 }
 0x150   : > { %v440_v31 = vmul.f32 %v433_v22, %v428_v30  ;;  %v441_v32 = vmul.f32 %v437_v23, %v427_v29 }
 0x152   : > { %v447_v38 = vpop.permute.xlu1 %446  ;;  %v442_v41 = vadd.f32 %v440_v31, %v420_v35  ;;  %v443_v42 = vadd.f32 %v441_v32, %v421_v36 }
 0x153   : > { %v449_v39 = vsel %vm448_vm3, %v445_v37, %v447_v38  ;;  %v450_v40 = vsel %vm448_vm3, %v447_v38, %v445_v37 }
 0x154   : > { %v462_v43 = vmul.f32 %v455_v33, %v449_v39  ;;  %v463_v21 = vmul.f32 %v459_v34, %v450_v40 }
 0x156   : > { %v464_v44 = vadd.f32 %v462_v43, %v442_v41  ;;  %v465_v45 = vadd.f32 %v463_v21, %v443_v42 }
 0x158   : > { %v468_v24 = vcombine.low %v464_v44, %v465_v45 }
 0x15a   : > { %v470_v27 = vmax.f32 %v991_v5, %v468_v24 }
 0x15c   : > { %471 = vst [vmem:[%s257_s14] sm:$0xff] %v470_v27 }
 0x15d   : > { %755 = shalt.err (!%p752_p6)
}
 0x15e   : > { %s756_s11 = scalar_lea.hbm %s1040_s6, 128  ;;  %s760_s13 = scalar_lea.hbm %s1093_s4, 256 }
 0x15f   : > { %p757_p4 = scmp.ne.s32.totalorder %s1040_s6, %s756_s11  ;;  %p761_p1 = scmp.lt.u32.totalorder %s1040_s6, %s1093_s4 }
 0x160   : > { %p762_p2 = scmp.lt.u32.totalorder %s760_s13, %s756_s11  ;;  %p764_p8 = scmp.lt.u32.totalorder %s756_s11, %s1040_s6 }
 0x161   : > { %p758_p10 = pnand %p757_p4, %p1102_p9 }
 0x162   : > { %p763_p5 = por %p762_p2, %p761_p1 }
 0x163   : > { %p759_p12 = pneg %p758_p10 }
 0x164   : > { %p765_p11 = por %p764_p8, %p763_p5 }
 0x166   : > { %p766_p0 = pnand %p765_p11, %p759_p12 }
 0x168   : > { %769 = shalt.err (!%p766_p0)
}
 0x169   : > { %627 = dma.vmem_to_hbm [thread:$0]  (%p1102_p9), %s1042_s24, 128, %s1040_s6, %s473_s5  }
 0x16a PF: > { %s501_s27 = sand.u32 1, %s804_s15   ;;  %p1103_p7 = scmp.ne.s32.totalorder %s1098_s30, 0 }
 0x16b   : > { %p1104_p13 = scmp.ge.s32.totalorder %s824_s20, 2  ;;  %s502_s14 = scalar_lea.sflag [#allocation4], %s501_s27 }
 0x16d   : > { %p634_p3 = pnand %p1104_p13, %p1103_p7 }
 0x16f   : > { %799 = dma.done.wait (!%p634_p3), %s502_s14, 128  }
 0x170   : > { %801 = vsyncadd (!%p634_p3), %s502_s14, 4294967168  ;;  %s20_s20 = sadd.s32 1, %s824_s20   ;;  %s1105_s15 = smov %s808_s16 }
 0x171   : > { %p17_p6 = scmp.ge.s32.totalorder %s20_s20, 4   ;;  %s1106_s16 = smov %s812_s17 }
 0x172   : > { %s1107_s17 = smov %s923_s29  ;;  %s1108_s18 = smov %s820_s19 }
 0x173   : > { %s1109_s19 = smov %s1111_s23  ;;  %19 = sbr.rel (!%p17_p6) target bundleno = 6 (0x6), region = 90 }
 0x17a   :  { %507 = vsyncpa [#allocation3], 1 }
 0x17b   :  { %509 = vsyncpa [#allocation3 + $0x1], 1 }
 0x17c   :  { %510 = vsyncpa [#allocation4], 1 }
 0x17d   :  { %512 = vsyncpa [#allocation4 + $0x1], 1 }

</bundles_post_ra>
